<compile_context>
chip_gen: v7x
topology: tpu7x:2x2x1
jax: 0.10.0
libtpu: 0.0.40
codegen_flags: <defaults>
</compile_context>

<pallas_src>
import functools

import jax
import jax.numpy as jnp
from jax.experimental import pallas as pl
from jax.experimental.pallas import tpu as pltpu


def _round_up(x: int, m: int) -> int:
    return (x + m - 1) // m * m


def mlp_kernel(x_ref, w1_ref, b1_ref, w2_ref, b2_ref, o_ref, acc_ref):
    k = pl.program_id(1)

    @pl.when(k == 0)
    def _():
        acc_ref[...] = jnp.zeros_like(acc_ref)

    # Hidden-layer partial product for this K slab: bf16 x bf16 -> f32 acc.
    acc_ref[...] += jnp.dot(x_ref[...], w1_ref[...],
                            preferred_element_type=jnp.float32)

    @pl.when(k == pl.num_programs(1) - 1)
    def _():
        # Bias add + ReLU in f32 (v5e VPU has no bf16), then second matmul on
        # the MXU in bf16 with f32 accumulation, lane-dense (padded-C) store.
        h = jnp.maximum(acc_ref[...] + b1_ref[...], 0.0)
        out = jnp.dot(h.astype(w2_ref.dtype), w2_ref[...],
                      preferred_element_type=jnp.float32)
        o_ref[...] = (out + b2_ref[...]).astype(o_ref.dtype)


@functools.partial(jax.jit, static_argnames=("tb", "max_tk"))
def mlp_classifier_forward(x_nchw, w1, b1, w2, b2, *, tb: int = 128,
                           max_tk: int = 2048):
    """x_nchw: (B, 3, H, W) float32. w1: (D, Hd), b1: (Hd,), w2: (Hd, C),
    b2: (C,). Returns (B, C) float32 logits (same math as the torch module,
    with bf16 MXU operands / f32 accumulation)."""
    B = x_nchw.shape[0]
    x_flat = x_nchw.reshape(B, -1)           # same order as nn.Flatten on NCHW
    D = x_flat.shape[1]
    Hd = w1.shape[1]
    C = w2.shape[1]

    # ---- padded / tiled sizes ------------------------------------------------
    TB = tb                                   # batch tile (MXU/sublane aligned)
    Bp = _round_up(max(B, TB), TB)
    Hp = _round_up(Hd, 128)                   # hidden dim, lane aligned
    Cp = _round_up(C, 128)                    # class dim, lane-dense output
    D128 = _round_up(D, 128)
    TK = D128 if D128 <= max_tk else max_tk   # K slab of the reduction dim
    Dp = _round_up(D128, TK)
    nb, nk = Bp // TB, Dp // TK

    # ---- zero-pad operands (exact: pads contribute 0 to every dot) ----------
    xp = jnp.pad(x_flat.astype(jnp.bfloat16), ((0, Bp - B), (0, Dp - D)))
    w1p = jnp.pad(w1.astype(jnp.bfloat16), ((0, Dp - D), (0, Hp - Hd)))
    b1p = jnp.pad(b1.astype(jnp.float32), (0, Hp - Hd)).reshape(1, Hp)
    w2p = jnp.pad(w2.astype(jnp.bfloat16), ((0, Hp - Hd), (0, Cp - C)))
    b2p = jnp.pad(b2.astype(jnp.float32), (0, Cp - C)).reshape(1, Cp)

    flops = 2 * Bp * Dp * Hp + 2 * Bp * Hp * Cp
    bytes_accessed = int(xp.size * 2 + w1p.size * 2 + w2p.size * 2
                         + b1p.size * 4 + b2p.size * 4 + Bp * Cp * 4)

    grid_spec = pltpu.PrefetchScalarGridSpec(
        num_scalar_prefetch=0,
        grid=(nb, nk),
        in_specs=[
            pl.BlockSpec((TB, TK), lambda i, k: (i, k)),   # x: streamed tiles
            pl.BlockSpec((TK, Hp), lambda i, k: (k, 0)),   # w1: K slabs
            pl.BlockSpec((1, Hp), lambda i, k: (0, 0)),    # b1: resident
            pl.BlockSpec((Hp, Cp), lambda i, k: (0, 0)),   # w2: resident
            pl.BlockSpec((1, Cp), lambda i, k: (0, 0)),    # b2: resident
        ],
        out_specs=pl.BlockSpec((TB, Cp), lambda i, k: (i, 0)),
        scratch_shapes=[pltpu.VMEM((TB, Hp), jnp.float32)],  # f32 hidden acc
    )

    out_padded = pl.pallas_call(
        mlp_kernel,
        out_shape=jax.ShapeDtypeStruct((Bp, Cp), jnp.float32),
        grid_spec=grid_spec,
        compiler_params=pltpu.CompilerParams(
            dimension_semantics=("parallel", "arbitrary"),
            vmem_limit_bytes=32 * 1024 * 1024,
        ),
        cost_estimate=pl.CostEstimate(
            flops=flops, transcendentals=0, bytes_accessed=bytes_accessed),
    )(xp, w1p, b1p, w2p, b2p)

    return out_padded[:B, :C]


def init_params(key, input_dim, hidden_dim, num_classes):
    """Deterministic init mimicking torch.nn.Linear defaults U(-1/sqrt(fan_in), +).
    Weights stored as (in_features, out_features) so the kernel does x @ W + b
    (equivalent to torch's x @ W.T with torch-layout weights)."""
    k1, k2, k3, k4 = jax.random.split(key, 4)
    lim1 = 1.0 / jnp.sqrt(jnp.float32(input_dim))
    lim2 = 1.0 / jnp.sqrt(jnp.float32(hidden_dim))
    w1 = jax.random.uniform(k1, (input_dim, hidden_dim), jnp.float32, -lim1, lim1)
    b1 = jax.random.uniform(k2, (hidden_dim,), jnp.float32, -lim1, lim1)
    w2 = jax.random.uniform(k3, (hidden_dim, num_classes), jnp.float32, -lim2, lim2)
    b2 = jax.random.uniform(k4, (num_classes,), jnp.float32, -lim2, lim2)
    return w1, b1, w2, b2


if __name__ == "__main__":
    # Small shapes consistent with the module: B=2, 3 channels, 16x16 image.
    B, Cin, H, W = 2, 3, 16, 16
    hidden_dim, num_classes = 128, 6
    input_dim = Cin * H * W

    key = jax.random.PRNGKey(0)
    kx, kp = jax.random.split(key)
    x = jax.random.normal(kx, (B, Cin, H, W), jnp.float32)
    w1, b1, w2, b2 = init_params(kp, input_dim, hidden_dim, num_classes)

    logits = mlp_classifier_forward(x, w1, b1, w2, b2)
    logits = jax.block_until_ready(logits)

    # Reference in plain f32 JAX (kernel uses bf16 operands / f32 accumulation,
    # so tolerances are loosened accordingly).
    x_flat = x.reshape(B, -1)
    ref = jnp.maximum(x_flat @ w1 + b1, 0.0) @ w2 + b2
    assert logits.shape == (B, num_classes)
    assert jnp.allclose(logits, ref, atol=5e-2, rtol=5e-2), (
        f"max abs diff {jnp.max(jnp.abs(logits - ref))}")

    print("KERNEL_OK")
</pallas_src>

<mosaic_0001>
module attributes {stable_mosaic.version = 11 : i64} {
  func.func @mlp_kernel(%arg0: i32, %arg1: i32, %arg2: memref<128x768xbf16, #tpu.memory_space<vmem>>, %arg3: memref<768x128xbf16, #tpu.memory_space<vmem>>, %arg4: memref<1x128xf32, #tpu.memory_space<vmem>>, %arg5: memref<128x128xbf16, #tpu.memory_space<vmem>>, %arg6: memref<1x128xf32, #tpu.memory_space<vmem>>, %arg7: memref<128x128xf32, #tpu.memory_space<vmem>>, %arg8: memref<128x128xf32, #tpu.memory_space<vmem>>) attributes {dimension_semantics = [#tpu.dimension_semantics<parallel>, #tpu.dimension_semantics<arbitrary>], iteration_bounds = array<i64: 1, 1>, scalar_prefetch = 0 : i64, scratch_operands = 1 : i64, tpu.core_type = #tpu.core_type<tc>, window_params = [{transform_indices = @transform_0, window_bounds = array<i64: 128, 768>}, {transform_indices = @transform_1, window_bounds = array<i64: 768, 128>}, {pipeline_mode = #tpu.pipeline_mode<synchronous>, transform_indices = @transform_2, window_bounds = array<i64: 1, 128>}, {pipeline_mode = #tpu.pipeline_mode<synchronous>, transform_indices = @transform_3, window_bounds = array<i64: 128, 128>}, {pipeline_mode = #tpu.pipeline_mode<synchronous>, transform_indices = @transform_4, window_bounds = array<i64: 1, 128>}, {transform_indices = @transform_5, window_bounds = array<i64: 128, 128>}]} {
    %c0_i32 = arith.constant 0 : i32
    %0 = arith.cmpi eq, %arg1, %c0_i32 : i32
    %1 = arith.extui %0 : i1 to i32
    %c0_i32_0 = arith.constant 0 : i32
    %2 = arith.cmpi ne, %1, %c0_i32_0 : i32
    scf.if %2 {
      %cst_10 = arith.constant 0.000000e+00 : f32
      %12 = vector.broadcast %cst_10 : f32 to vector<128x128xf32>
      %c0_11 = arith.constant 0 : index
      %c0_12 = arith.constant 0 : index
      %13 = vector.load %arg8[%c0_11, %c0_12] : memref<128x128xf32, #tpu.memory_space<vmem>>, vector<128x128xf32>
      tpu.vector_store %arg8[%c0_11, %c0_12], %12 {strides = array<i32>} : memref<128x128xf32, #tpu.memory_space<vmem>>, vector<128x128xf32>,
    } else {
    }
    %c0 = arith.constant 0 : index
    %c0_1 = arith.constant 0 : index
    %3 = vector.load %arg8[%c0, %c0_1] : memref<128x128xf32, #tpu.memory_space<vmem>>, vector<128x128xf32>
    %c0_2 = arith.constant 0 : index
    %c0_3 = arith.constant 0 : index
    %4 = vector.load %arg2[%c0_2, %c0_3] : memref<128x768xbf16, #tpu.memory_space<vmem>>, vector<128x768xbf16>
    %c0_4 = arith.constant 0 : index
    %c0_5 = arith.constant 0 : index
    %5 = vector.load %arg3[%c0_4, %c0_5] : memref<768x128xbf16, #tpu.memory_space<vmem>>, vector<768x128xbf16>
    %cst = arith.constant dense<0.000000e+00> : vector<128x128xf32>
    %6 = tpu.matmul %4, %5, %cst {dimension_numbers = #tpu.dot_dimension_numbers<[1], [0], [0], [1], [0, 0, 1, 1], [], []>} : vector<128x768xbf16>, vector<768x128xbf16>, vector<128x128xf32> -> vector<128x128xf32>
    %7 = arith.addf %3, %6 : vector<128x128xf32>
    %c0_6 = arith.constant 0 : index
    %c0_7 = arith.constant 0 : index
    %8 = vector.load %arg8[%c0_6, %c0_7] : memref<128x128xf32, #tpu.memory_space<vmem>>, vector<128x128xf32>
    tpu.vector_store %arg8[%c0_6, %c0_7], %7 {strides = array<i32>} : memref<128x128xf32, #tpu.memory_space<vmem>>, vector<128x128xf32>,
    %c0_i32_8 = arith.constant 0 : i32
    %9 = arith.cmpi eq, %arg1, %c0_i32_8 : i32
    %10 = arith.extui %9 : i1 to i32
    %c0_i32_9 = arith.constant 0 : i32
    %11 = arith.cmpi ne, %10, %c0_i32_9 : i32
    scf.if %11 {
      %c0_10 = arith.constant 0 : index
      %c0_11 = arith.constant 0 : index
      %12 = vector.load %arg8[%c0_10, %c0_11] : memref<128x128xf32, #tpu.memory_space<vmem>>, vector<128x128xf32>
      %c0_12 = arith.constant 0 : index
      %c0_13 = arith.constant 0 : index
      %13 = vector.load %arg4[%c0_12, %c0_13] : memref<1x128xf32, #tpu.memory_space<vmem>>, vector<1x128xf32>
      %14 = vector.broadcast %13 : vector<1x128xf32> to vector<128x128xf32>
      %15 = arith.addf %12, %14 : vector<128x128xf32>
      %cst_14 = arith.constant 0.000000e+00 : f32
      %16 = vector.broadcast %cst_14 : f32 to vector<128x128xf32>
      %17 = arith.maximumf %15, %16 : vector<128x128xf32>
      %18 = arith.truncf %17 : vector<128x128xf32> to vector<128x128xbf16>
      %c0_15 = arith.constant 0 : index
      %c0_16 = arith.constant 0 : index
      %19 = vector.load %arg5[%c0_15, %c0_16] : memref<128x128xbf16, #tpu.memory_space<vmem>>, vector<128x128xbf16>
      %cst_17 = arith.constant dense<0.000000e+00> : vector<128x128xf32>
      %20 = tpu.matmul %18, %19, %cst_17 {dimension_numbers = #tpu.dot_dimension_numbers<[1], [0], [0], [1], [0, 0, 1, 1], [], []>} : vector<128x128xbf16>, vector<128x128xbf16>, vector<128x128xf32> -> vector<128x128xf32>
      %c0_18 = arith.constant 0 : index
      %c0_19 = arith.constant 0 : index
      %21 = vector.load %arg6[%c0_18, %c0_19] : memref<1x128xf32, #tpu.memory_space<vmem>>, vector<1x128xf32>
      %22 = vector.broadcast %21 : vector<1x128xf32> to vector<128x128xf32>
      %23 = arith.addf %20, %22 : vector<128x128xf32>
      %c0_20 = arith.constant 0 : index
      %c0_21 = arith.constant 0 : index
      %24 = vector.load %arg7[%c0_20, %c0_21] : memref<128x128xf32, #tpu.memory_space<vmem>>, vector<128x128xf32>
      tpu.vector_store %arg7[%c0_20, %c0_21], %23 {strides = array<i32>} : memref<128x128xf32, #tpu.memory_space<vmem>>, vector<128x128xf32>,
    } else {
    }
    return
  }
  func.func @transform_0(%arg0: i32, %arg1: i32) -> (i32, i32) {
    %c0_i32 = arith.constant 0 : i32
    return %arg0, %arg1 : i32, i32
  }
  func.func @transform_1(%arg0: i32, %arg1: i32) -> (i32, i32) {
    %c0_i32 = arith.constant 0 : i32
    %c0_i32_0 = arith.constant 0 : i32
    return %arg1, %c0_i32 : i32, i32
  }
  func.func @transform_2(%arg0: i32, %arg1: i32) -> (i32, i32) {
    %c0_i32 = arith.constant 0 : i32
    %c0_i32_0 = arith.constant 0 : i32
    %c0_i32_1 = arith.constant 0 : i32
    return %c0_i32, %c0_i32_0 : i32, i32
  }
  func.func @transform_3(%arg0: i32, %arg1: i32) -> (i32, i32) {
    %c0_i32 = arith.constant 0 : i32
    %c0_i32_0 = arith.constant 0 : i32
    %c0_i32_1 = arith.constant 0 : i32
    return %c0_i32, %c0_i32_0 : i32, i32
  }
  func.func @transform_4(%arg0: i32, %arg1: i32) -> (i32, i32) {
    %c0_i32 = arith.constant 0 : i32
    %c0_i32_0 = arith.constant 0 : i32
    %c0_i32_1 = arith.constant 0 : i32
    return %c0_i32, %c0_i32_0 : i32, i32
  }
  func.func @transform_5(%arg0: i32, %arg1: i32) -> (i32, i32) {
    %c0_i32 = arith.constant 0 : i32
    %c0_i32_0 = arith.constant 0 : i32
    return %arg0, %c0_i32 : i32, i32
  }
}

</mosaic_0001>

<bundles_post_ra>
// kernel: mlp_classifier_forward.1
= control target key start
LH: loop header
LB: loop body
LE: loop exit
PB: predicated region body
PF: predicated region fallthrough
CT: control target
= control target key end

     0   :  { %s2242_s1 = inlined_call_operand.vmem [shape: bf16[768,128], index: 1, kind: input, shape index: {}]   ;;  %s2243_s0 = inlined_call_operand.vmem [shape: bf16[128,768], index: 0, kind: input, shape index: {}]   ;;  %s2244_s3 = inlined_call_operand.vmem [shape: bf16[128,128], index: 3, kind: input, shape index: {}]   ;;  %s2245_s2 = inlined_call_operand.vmem [shape: f32[1,128], index: 2, kind: input, shape index: {}]   ;;  %s2246_s4 = inlined_call_operand.vmem [shape: f32[1,128], index: 4, kind: input, shape index: {}]   ;;  %s2247_s5 = inlined_call_operand.vmem [shape: f32[128,128], index: 5, kind: output, shape index: {}]  }
   0x1   :  { %v1652_v0 = vld [vmem:[%s2242_s1 + $0x40] sm:$0xff]   ;;  %v1656_v4 = vld [vmem:[%s2242_s1 + $0x48] sm:$0xff]   ;;  %v1660_v8 = vld [vmem:[%s2242_s1 + $0x50] sm:$0xff]  }
   0x2   :  { %v1653_v1 = vld [vmem:[%s2242_s1 + $0xc0] sm:$0xff]   ;;  %1412 = vmatprep.subr.bf16.mxu0 %v1652_v0  ;;  %v1657_v5 = vld [vmem:[%s2242_s1 + $0xc8] sm:$0xff]   ;;  %v1661_v9 = vld [vmem:[%s2242_s1 + $0xd0] sm:$0xff]  }
   0x3   :  { %v1654_v2 = vld [vmem:[%s2242_s1] sm:$0xff]   ;;  %1476 = vmatprep.subr.bf16.mxu1 %v1653_v1  ;;  %v1658_v6 = vld [vmem:[%s2242_s1 + $0x8] sm:$0xff]   ;;  %v1662_v10 = vld [vmem:[%s2242_s1 + $0x10] sm:$0xff]  }
   0x4   :  { %v1655_v3 = vld [vmem:[%s2242_s1 + $0x80] sm:$0xff]   ;;  %1413 = vmatpush3.bf16.msra.mxu0 %v1654_v2  ;;  %v1659_v7 = vld [vmem:[%s2242_s1 + $0x88] sm:$0xff]   ;;  %v1663_v11 = vld [vmem:[%s2242_s1 + $0x90] sm:$0xff]  }
   0x5   :  { %1477 = vmatpush3.bf16.msra.mxu1 %v1655_v3  ;;  %1414 = vmatprep.subr.bf16.mxu0 %v1656_v4  ;;  %v1664_v12 = vld [vmem:[%s2242_s1 + $0x58] sm:$0xff]   ;;  %v1668_v16 = vld [vmem:[%s2242_s1 + $0x60] sm:$0xff]   ;;  %v1672_v20 = vld [vmem:[%s2242_s1 + $0x68] sm:$0xff]  }
   0x6   :  { %1478 = vmatprep.subr.bf16.mxu1 %v1657_v5  ;;  %v1665_v13 = vld [vmem:[%s2242_s1 + $0xd8] sm:$0xff]   ;;  %v1669_v17 = vld [vmem:[%s2242_s1 + $0xe0] sm:$0xff]   ;;  %v1673_v21 = vld [vmem:[%s2242_s1 + $0xe8] sm:$0xff]  }
   0x7   :  { %v1666_v14 = vld [vmem:[%s2242_s1 + $0x18] sm:$0xff]   ;;  %v1670_v18 = vld [vmem:[%s2242_s1 + $0x20] sm:$0xff]   ;;  %v1674_v22 = vld [vmem:[%s2242_s1 + $0x28] sm:$0xff]  }
   0x8   :  { %1415 = vmatpush3.bf16.msra.mxu0 %v1658_v6  ;;  %v1667_v15 = vld [vmem:[%s2242_s1 + $0x98] sm:$0xff]   ;;  %v1671_v19 = vld [vmem:[%s2242_s1 + $0xa0] sm:$0xff]   ;;  %v1675_v23 = vld [vmem:[%s2242_s1 + $0xa8] sm:$0xff]  }
   0x9   :  { %1479 = vmatpush3.bf16.msra.mxu1 %v1659_v7  ;;  %1416 = vmatprep.subr.bf16.mxu0 %v1660_v8  ;;  %v1676_v24 = vld [vmem:[%s2242_s1 + $0x70] sm:$0xff]   ;;  %v1680_v28 = vld [vmem:[%s2242_s1 + $0x78] sm:$0xff]   ;;  %v1687_v34 = vld [vmem:[%s2243_s0 + $0x8] ss:$24 sps:$4 sm:$0xff]  }
   0xa   :  { %1480 = vmatprep.subr.bf16.mxu1 %v1661_v9  ;;  %v1677_v25 = vld [vmem:[%s2242_s1 + $0xf0] sm:$0xff]   ;;  %v1681_v29 = vld [vmem:[%s2242_s1 + $0xf8] sm:$0xff]   ;;  %v1689_v35 = vld [vmem:[%s2243_s0 + $0xc] ss:$24 sps:$4 sm:$0xff]  }
   0xb   :  { %v1678_v26 = vld [vmem:[%s2242_s1 + $0x30] sm:$0xff]   ;;  %v1682_v30 = vld [vmem:[%s2242_s1 + $0x38] sm:$0xff]   ;;  %v1690_v36 = vld [vmem:[%s2242_s1 + $0x140] sm:$0xff]   ;;  %858 = vmatprep.mubr.bf16.mxu1 %v1689_v35 }
   0xc   :  { %1417 = vmatpush3.bf16.msra.mxu0 %v1662_v10  ;;  %v1679_v27 = vld [vmem:[%s2242_s1 + $0xb0] sm:$0xff]   ;;  %v1683_v31 = vld [vmem:[%s2242_s1 + $0xb8] sm:$0xff]   ;;  %v1691_v37 = vld [vmem:[%s2242_s1 + $0x100] sm:$0xff]  }
   0xd   :  { %1481 = vmatpush3.bf16.msra.mxu1 %v1663_v11  ;;  %1418 = vmatprep.subr.bf16.mxu0 %v1664_v12  ;;  %v1684_v32 = vld [vmem:[%s2243_s0] ss:$24 sps:$4 sm:$0xff]   ;;  %v1686_v33 = vld [vmem:[%s2243_s0 + $0x4] ss:$24 sps:$4 sm:$0xff]   ;;  %v1692_v38 = vld [vmem:[%s2243_s0 + $0x34] ss:$24 sps:$4 sm:$0xff]  }
   0xe   :  { %1482 = vmatprep.subr.bf16.mxu1 %v1665_v13  ;;  %761 = vmatprep.mubr.bf16.mxu0 %v1686_v33  ;;  %v1694_v39 = vld [vmem:[%s2243_s0 + $0x3c] ss:$24 sps:$4 sm:$0xff]   ;;  %v1696_v40 = vld [vmem:[%s2243_s0 + $0x30] ss:$24 sps:$4 sm:$0xff]   ;;  %v1702_v45 = vld [vmem:[%s2243_s0 + $0x6c] ss:$24 sps:$4 sm:$0xff]  }
   0xf   :  { %v1697_v41 = vld [vmem:[%s2243_s0 + $0x38] ss:$24 sps:$4 sm:$0xff]   ;;  %v1698_v42 = vld [vmem:[%s2242_s1 + $0x148] sm:$0xff]   ;;  %v1700_v44 = vld [vmem:[%s2243_s0 + $0x64] ss:$24 sps:$4 sm:$0xff]  }
  0x10   :  { %1419 = vmatpush3.bf16.msra.mxu0 %v1666_v14  ;;  %v1699_v43 = vld [vmem:[%s2242_s1 + $0x108] sm:$0xff]   ;;  %v1706_v46 = vld [vmem:[%s2242_s1 + $0x150] sm:$0xff]   ;;  %v1704_v48 = vld [vmem:[%s2243_s0 + $0x60] ss:$24 sps:$4 sm:$0xff]  }
  0x11   :  { %1483 = vmatpush3.bf16.msra.mxu1 %v1667_v15  ;;  %1420 = vmatprep.subr.bf16.mxu0 %v1668_v16  ;;  %v1707_v47 = vld [vmem:[%s2242_s1 + $0x110] sm:$0xff]   ;;  %v1705_v49 = vld [vmem:[%s2243_s0 + $0x68] ss:$24 sps:$4 sm:$0xff]   ;;  %v1714_v52 = vld [vmem:[%s2242_s1 + $0x158] sm:$0xff]  }
  0x12   :  { %1484 = vmatprep.subr.bf16.mxu1 %v1669_v17  ;;  %v1708_v50 = vld [vmem:[%s2243_s0 + $0x94] ss:$24 sps:$4 sm:$0xff]   ;;  %v1715_v53 = vld [vmem:[%s2242_s1 + $0x118] sm:$0xff]   ;;  %v1722_v54 = vld [vmem:[%s2242_s1 + $0x160] sm:$0xff]  }
  0x13   :  { %v1710_v51 = vld [vmem:[%s2243_s0 + $0x9c] ss:$24 sps:$4 sm:$0xff]   ;;  %v1723_v55 = vld [vmem:[%s2242_s1 + $0x120] sm:$0xff]   ;;  %v1712_v56 = vld [vmem:[%s2243_s0 + $0x90] ss:$24 sps:$4 sm:$0xff]  }
  0x14   :  { %1421 = vmatpush3.bf16.msra.mxu0 %v1670_v18  ;;  %v1713_v57 = vld [vmem:[%s2243_s0 + $0x98] ss:$24 sps:$4 sm:$0xff]   ;;  %v1716_v58 = vld [vmem:[%s2243_s0 + $0xc4] ss:$24 sps:$4 sm:$0xff]   ;;  %v1730_v60 = vld [vmem:[%s2242_s1 + $0x168] sm:$0xff]  }
  0x15   :  { %1485 = vmatpush3.bf16.msra.mxu1 %v1671_v19  ;;  %1422 = vmatprep.subr.bf16.mxu0 %v1672_v20  ;;  %v1718_v59 = vld [vmem:[%s2243_s0 + $0xcc] ss:$24 sps:$4 sm:$0xff]   ;;  %v1720_v62 = vld [vmem:[%s2243_s0 + $0xc0] ss:$24 sps:$4 sm:$0xff]   ;;  %v1738_v0 = vld [vmem:[%s2242_s1 + $0x170] sm:$0xff]  }
  0x16   :  { %1486 = vmatprep.subr.bf16.mxu1 %v1673_v21  ;;  %v1731_v61 = vld [vmem:[%s2242_s1 + $0x128] sm:$0xff]   ;;  %v1739_v1 = vld [vmem:[%s2242_s1 + $0x130] sm:$0xff]   ;;  %v1746_v4 = vld [vmem:[%s2242_s1 + $0x178] sm:$0xff]  }
  0x17   :  { %v1721_v63 = vld [vmem:[%s2243_s0 + $0xc8] ss:$24 sps:$4 sm:$0xff]   ;;  %v1724_v2 = vld [vmem:[%s2243_s0 + $0xf4] ss:$24 sps:$4 sm:$0xff]   ;;  %v1747_v5 = vld [vmem:[%s2242_s1 + $0x138] sm:$0xff]  }
  0x18   :  { %1423 = vmatpush3.bf16.msra.mxu0 %v1674_v22  ;;  %v1726_v3 = vld [vmem:[%s2243_s0 + $0xfc] ss:$24 sps:$4 sm:$0xff]   ;;  %v1728_v6 = vld [vmem:[%s2243_s0 + $0xf0] ss:$24 sps:$4 sm:$0xff]   ;;  %v1734_v9 = vld [vmem:[%s2243_s0 + $0x12c] ss:$24 sps:$4 sm:$0xff]  }
  0x19   :  { %1487 = vmatpush3.bf16.msra.mxu1 %v1675_v23  ;;  %1424 = vmatprep.subr.bf16.mxu0 %v1676_v24  ;;  %v1729_v7 = vld [vmem:[%s2243_s0 + $0xf8] ss:$24 sps:$4 sm:$0xff]   ;;  %v1732_v8 = vld [vmem:[%s2243_s0 + $0x124] ss:$24 sps:$4 sm:$0xff]   ;;  %v1737_v11 = vld [vmem:[%s2243_s0 + $0x128] ss:$24 sps:$4 sm:$0xff]  }
  0x1a   :  { %1488 = vmatprep.subr.bf16.mxu1 %v1677_v25  ;;  %v1736_v10 = vld [vmem:[%s2243_s0 + $0x120] ss:$24 sps:$4 sm:$0xff]   ;;  %v1740_v12 = vld [vmem:[%s2243_s0 + $0x154] ss:$24 sps:$4 sm:$0xff]   ;;  %v1744_v14 = vld [vmem:[%s2243_s0 + $0x150] ss:$24 sps:$4 sm:$0xff]  }
  0x1b   :  { %v1742_v13 = vld [vmem:[%s2243_s0 + $0x15c] ss:$24 sps:$4 sm:$0xff]   ;;  %v1745_v15 = vld [vmem:[%s2243_s0 + $0x158] ss:$24 sps:$4 sm:$0xff]   ;;  %v1773_v33 = vld [vmem:[%s2244_s3 + $0x8] sm:$0xff]  }
  0x1c   :  { %1425 = vmatpush3.bf16.msra.mxu0 %v1678_v26  ;;  %v1750_v16 = vld [vmem:[%s2243_s0 + $0x14] ss:$24 sps:$4 sm:$0xff]   ;;  %v1748_v17 = vld [vmem:[%s2243_s0 + $0x10] ss:$24 sps:$4 sm:$0xff]   ;;  %v1751_v18 = vld [vmem:[%s2243_s0 + $0x44] ss:$24 sps:$4 sm:$0xff]  }
  0x1d   :  { %1489 = vmatpush3.bf16.msra.mxu1 %v1679_v27  ;;  %1426 = vmatprep.subr.bf16.mxu0 %v1680_v28  ;;  %v1753_v19 = vld [vmem:[%s2243_s0 + $0x40] ss:$24 sps:$4 sm:$0xff]   ;;  %v1754_v20 = vld [vmem:[%s2243_s0 + $0x74] ss:$24 sps:$4 sm:$0xff]   ;;  %v1756_v21 = vld [vmem:[%s2243_s0 + $0x70] ss:$24 sps:$4 sm:$0xff]  }
  0x1e   :  { %1490 = vmatprep.subr.bf16.mxu1 %v1681_v29  ;;  %v1757_v22 = vld [vmem:[%s2243_s0 + $0xa4] ss:$24 sps:$4 sm:$0xff]   ;;  %v1759_v23 = vld [vmem:[%s2243_s0 + $0xa0] ss:$24 sps:$4 sm:$0xff]   ;;  %v1760_v24 = vld [vmem:[%s2243_s0 + $0xd4] ss:$24 sps:$4 sm:$0xff]  }
  0x1f   :  { %v1762_v25 = vld [vmem:[%s2243_s0 + $0xd0] ss:$24 sps:$4 sm:$0xff]   ;;  %v1763_v26 = vld [vmem:[%s2243_s0 + $0x104] ss:$24 sps:$4 sm:$0xff]   ;;  %v1765_v27 = vld [vmem:[%s2243_s0 + $0x100] ss:$24 sps:$4 sm:$0xff]  }
  0x20   :  { %1427 = vmatpush3.bf16.msra.mxu0 %v1682_v30  ;;  %v1766_v28 = vld [vmem:[%s2243_s0 + $0x134] ss:$24 sps:$4 sm:$0xff]   ;;  %v1768_v29 = vld [vmem:[%s2243_s0 + $0x130] ss:$24 sps:$4 sm:$0xff]   ;;  %v1769_v30 = vld [vmem:[%s2243_s0 + $0x164] ss:$24 sps:$4 sm:$0xff]  }
  0x21   :  { %1491 = vmatpush3.bf16.msra.mxu1 %v1683_v31  ;;  %1540 = vmatprep.subr.bf16.mxu0 %v1690_v36  ;;  %v1771_v31 = vld [vmem:[%s2243_s0 + $0x160] ss:$24 sps:$4 sm:$0xff]  }
  0x22   :  { %v1775_v35 = vld [vmem:[%s2244_s3 + $0x18] sm:$0xff]   ;;  %v1776_v36 = vld [vmem:[%s2244_s3 + $0x20] sm:$0xff]  }
  0x23   :  { %762 = vmatmul.mubr.bf16.vlgmr.msra.gmra.mrb[0].mxu0 %v1684_v32  ;;  %v1772_v32 = vld [vmem:[%s2244_s3] sm:$0xff]  }
  0x24   :  { %859 = vmatmul.mubr.bf16.vlgmr.msra.gmra.mrb[0].mxu1 %v1687_v34  ;;  %1541 = vmatpush3.bf16.msra.mxu0 %v1691_v37  ;;  %v1774_v34 = vld [vmem:[%s2244_s3 + $0x10] sm:$0xff]   ;;  %v1777_v37 = vld [vmem:[%s2244_s3 + $0x28] sm:$0xff]  }
  0x25   :  { %769 = vmatprep.mubr.bf16.mxu0 %v1692_v38  ;;  %866 = vmatprep.mubr.bf16.mxu1 %v1694_v39  ;;  %v1778_v38 = vld [vmem:[%s2244_s3 + $0x30] sm:$0xff]   ;;  %v1779_v39 = vld [vmem:[%s2244_s3 + $0x38] sm:$0xff]  }
  0x26   :  { %1542 = vmatprep.subr.bf16.mxu0 %v1698_v42  ;;  %1620 = vmatprep.subr.bf16.mxu1 %v1772_v32 }
  0x27   :  { %1621 = vmatpush3.bf16.msra.mxu1 %v1772_v32 }
  0x28   :  { %1543 = vmatpush3.bf16.msra.mxu0 %v1699_v43  ;;  %1622 = vmatprep.subr.bf16.mxu1 %v1773_v33 }
  0x29   :  { %1544 = vmatprep.subr.bf16.mxu0 %v1706_v46 }
  0x2b   :  { %770 = vmatmul.mubr.bf16.gmra.mrb[4].mxu0 %v1696_v40  ;;  %1623 = vmatpush3.bf16.msra.mxu1 %v1773_v33 }
  0x2c   :  { %867 = vmatmul.mubr.bf16.gmra.mrb[4].mxu1 %v1697_v41  ;;  %777 = vmatprep.mubr.bf16.mxu0 %v1700_v44 }
  0x2d   :  { %874 = vmatprep.mubr.bf16.mxu1 %v1702_v45  ;;  %1545 = vmatpush3.bf16.msra.mxu0 %v1707_v47 }
  0x2e   :  { %1546 = vmatprep.subr.bf16.mxu0 %v1714_v52  ;;  %1624 = vmatprep.subr.bf16.mxu1 %v1774_v34 }
  0x2f   :  { %1625 = vmatpush3.bf16.msra.mxu1 %v1774_v34 }
  0x30   :  { %1626 = vmatprep.subr.bf16.mxu1 %v1775_v35 }
  0x31   :  { %1547 = vmatpush3.bf16.msra.mxu0 %v1715_v53 }
  0x32   :  { %1548 = vmatprep.subr.bf16.mxu0 %v1722_v54 }
  0x33   :  { %778 = vmatmul.mubr.bf16.gmra.mrb[8].mxu0 %v1704_v48  ;;  %1627 = vmatpush3.bf16.msra.mxu1 %v1775_v35 }
  0x34   :  { %875 = vmatmul.mubr.bf16.gmra.mrb[8].mxu1 %v1705_v49  ;;  %785 = vmatprep.mubr.bf16.mxu0 %v1708_v50 }
  0x35   :  { %882 = vmatprep.mubr.bf16.mxu1 %v1710_v51  ;;  %1549 = vmatpush3.bf16.msra.mxu0 %v1723_v55 }
  0x36   :  { %1550 = vmatprep.subr.bf16.mxu0 %v1730_v60  ;;  %1628 = vmatprep.subr.bf16.mxu1 %v1776_v36 }
  0x37   :  { %1629 = vmatpush3.bf16.msra.mxu1 %v1776_v36 }
  0x38   :  { %1630 = vmatprep.subr.bf16.mxu1 %v1777_v37 }
  0x39   :  { %1551 = vmatpush3.bf16.msra.mxu0 %v1731_v61 }
  0x3a   :  { %1552 = vmatprep.subr.bf16.mxu0 %v1738_v0 }
  0x3b   :  { %786 = vmatmul.mubr.bf16.gmra.mrb[12].mxu0 %v1712_v56  ;;  %1631 = vmatpush3.bf16.msra.mxu1 %v1777_v37 }
  0x3c   :  { %883 = vmatmul.mubr.bf16.gmra.mrb[12].mxu1 %v1713_v57  ;;  %793 = vmatprep.mubr.bf16.mxu0 %v1716_v58 }
  0x3d   :  { %890 = vmatprep.mubr.bf16.mxu1 %v1718_v59  ;;  %1553 = vmatpush3.bf16.msra.mxu0 %v1739_v1 }
  0x3e   :  { %1554 = vmatprep.subr.bf16.mxu0 %v1746_v4  ;;  %1632 = vmatprep.subr.bf16.mxu1 %v1778_v38 }
  0x3f   :  { %1633 = vmatpush3.bf16.msra.mxu1 %v1778_v38 }
  0x40   :  { %1634 = vmatprep.subr.bf16.mxu1 %v1779_v39 }
  0x41   :  { %1555 = vmatpush3.bf16.msra.mxu0 %v1747_v5 }
  0x43   :  { %794 = vmatmul.mubr.bf16.gmra.mrb[16].mxu0 %v1720_v62  ;;  %1635 = vmatpush3.bf16.msra.mxu1 %v1779_v39 }
  0x44   :  { %891 = vmatmul.mubr.bf16.gmra.mrb[16].mxu1 %v1721_v63  ;;  %801 = vmatprep.mubr.bf16.mxu0 %v1724_v2 }
  0x45   :  { %898 = vmatprep.mubr.bf16.mxu1 %v1726_v3 }
  0x4b   :  { %802 = vmatmul.mubr.bf16.gmra.mrb[20].mxu0 %v1728_v6 }
  0x4c   :  { %899 = vmatmul.mubr.bf16.gmra.mrb[20].mxu1 %v1729_v7  ;;  %809 = vmatprep.mubr.bf16.mxu0 %v1732_v8 }
  0x4d   :  { %906 = vmatprep.mubr.bf16.mxu1 %v1734_v9 }
  0x53   :  { %810 = vmatmul.mubr.bf16.gmra.mrb[24].mxu0 %v1736_v10 }
  0x54   :  { %907 = vmatmul.mubr.bf16.gmra.mrb[24].mxu1 %v1737_v11  ;;  %817 = vmatprep.mubr.bf16.mxu0 %v1740_v12 }
  0x55   :  { %914 = vmatprep.mubr.bf16.mxu1 %v1742_v13 }
  0x5b   :  { %818 = vmatmul.mubr.bf16.gmra.mrb[28].mxu0 %v1744_v14 }
  0x5c   :  { %915 = vmatmul.mubr.bf16.gmra.mrb[28].mxu1 %v1745_v15  ;;  %955 = vmatprep.mubr.bf16.mxu0 %v1750_v16 }
  0x63   :  { %956 = vmatmul.mubr.bf16.vlgmr.msra.gmra.mrb[32].mxu0 %v1748_v17 }
  0x64   :  { %963 = vmatprep.mubr.bf16.mxu0 %v1751_v18 }
  0x6b   :  { %964 = vmatmul.mubr.bf16.gmra.mrb[36].mxu0 %v1753_v19 }
  0x6c   :  { %971 = vmatprep.mubr.bf16.mxu0 %v1754_v20 }
  0x73   :  { %972 = vmatmul.mubr.bf16.gmra.mrb[40].mxu0 %v1756_v21 }
  0x74   :  { %979 = vmatprep.mubr.bf16.mxu0 %v1757_v22 }
  0x7b   :  { %980 = vmatmul.mubr.bf16.gmra.mrb[44].mxu0 %v1759_v23 }
  0x7c   :  { %987 = vmatprep.mubr.bf16.mxu0 %v1760_v24 }
  0x83   :  { %988 = vmatmul.mubr.bf16.gmra.mrb[48].mxu0 %v1762_v25 }
  0x84   :  { %995 = vmatprep.mubr.bf16.mxu0 %v1763_v26 }
  0x8b   :  { %996 = vmatmul.mubr.bf16.gmra.mrb[52].mxu0 %v1765_v27 }
  0x8c   :  { %1003 = vmatprep.mubr.bf16.mxu0 %v1766_v28 }
  0x93   :  { %1004 = vmatmul.mubr.bf16.gmra.mrb[56].mxu0 %v1768_v29 }
  0x94   :  { %1011 = vmatprep.mubr.bf16.mxu0 %v1769_v30 }
  0x9b   :  { %1012 = vmatmul.mubr.bf16.gmra.mrb[60].mxu0 %v1771_v31 }
  0xf6   :  { %v1428_v40 = vpop.f32.mrb[0].mxu0 }
  0xf7   :  { %v1492_v41 = vpop.f32.mrb[0].mxu1  ;;  %v1429_v42 = vpop.f32.mrb[1].mxu0 }
  0xf8   :  { %v1430_v43 = vadd.f32 %v1429_v42, %v1428_v40  ;;  %v1493_v44 = vpop.f32.mrb[1].mxu1  ;;  %v1431_v45 = vpop.f32.mrb[2].mxu0 }
  0xf9   :  { %v1494_v46 = vadd.f32 %v1493_v44, %v1492_v41  ;;  %v1495_v47 = vpop.f32.mrb[2].mxu1  ;;  %v1432_v48 = vpop.f32.mrb[3].mxu0 }
  0xfa   :  { %v1433_v49 = vadd.f32 %v1432_v48, %v1431_v45  ;;  %v1496_v50 = vpop.f32.mrb[3].mxu1 }
  0xfb   :  { %v2122_v51 = vadd.f32 %v1494_v46, %v1430_v43  ;;  %v1497_v52 = vadd.f32 %v1496_v50, %v1495_v47 }
  0xfd   :  { %v2124_v53 = vadd.f32 %v1497_v52, %v1433_v49 }
  0xfe   :  { %v1434_v54 = vpop.f32.mrb[4].mxu0 }
  0xff   :  { %v1498_v55 = vpop.f32.mrb[4].mxu1  ;;  %v1435_v56 = vpop.f32.mrb[5].mxu0 }
 0x100   :  { %v1436_v57 = vadd.f32 %v1435_v56, %v1434_v54  ;;  %v1499_v58 = vpop.f32.mrb[5].mxu1  ;;  %v1437_v59 = vpop.f32.mrb[6].mxu0 }
 0x101   :  { %v1500_v60 = vadd.f32 %v1499_v58, %v1498_v55  ;;  %v1501_v61 = vpop.f32.mrb[6].mxu1  ;;  %v1438_v62 = vpop.f32.mrb[7].mxu0 }
 0x102   :  { %v1439_v63 = vadd.f32 %v1438_v62, %v1437_v59  ;;  %v1502_v0 = vpop.f32.mrb[7].mxu1 }
 0x103   :  { %v2126_v1 = vadd.f32 %v1500_v60, %v1436_v57  ;;  %v1503_v2 = vadd.f32 %v1502_v0, %v1501_v61 }
 0x105   :  { %v2128_v3 = vadd.f32 %v1503_v2, %v1439_v63 }
 0x106   :  { %v1440_v4 = vpop.f32.mrb[8].mxu0 }
 0x107   :  { %v1504_v5 = vpop.f32.mrb[8].mxu1  ;;  %v1441_v6 = vpop.f32.mrb[9].mxu0 }
 0x108   :  { %v1442_v7 = vadd.f32 %v1441_v6, %v1440_v4  ;;  %v1505_v8 = vpop.f32.mrb[9].mxu1  ;;  %v1443_v9 = vpop.f32.mrb[10].mxu0 }
 0x109   :  { %v1506_v10 = vadd.f32 %v1505_v8, %v1504_v5  ;;  %v1507_v11 = vpop.f32.mrb[10].mxu1  ;;  %v1444_v12 = vpop.f32.mrb[11].mxu0 }
 0x10a   :  { %v1445_v13 = vadd.f32 %v1444_v12, %v1443_v9  ;;  %v1508_v14 = vpop.f32.mrb[11].mxu1 }
 0x10b   :  { %v2130_v15 = vadd.f32 %v1506_v10, %v1442_v7  ;;  %v1509_v16 = vadd.f32 %v1508_v14, %v1507_v11 }
 0x10d   :  { %v2132_v17 = vadd.f32 %v1509_v16, %v1445_v13 }
 0x10e   :  { %v1446_v18 = vpop.f32.mrb[12].mxu0 }
 0x10f   :  { %v1510_v19 = vpop.f32.mrb[12].mxu1  ;;  %v1447_v20 = vpop.f32.mrb[13].mxu0 }
 0x110   :  { %v1448_v21 = vadd.f32 %v1447_v20, %v1446_v18  ;;  %v1511_v22 = vpop.f32.mrb[13].mxu1  ;;  %v1449_v23 = vpop.f32.mrb[14].mxu0 }
 0x111   :  { %v1512_v24 = vadd.f32 %v1511_v22, %v1510_v19  ;;  %v1513_v25 = vpop.f32.mrb[14].mxu1  ;;  %v1450_v26 = vpop.f32.mrb[15].mxu0 }
 0x112   :  { %v1451_v27 = vadd.f32 %v1450_v26, %v1449_v23  ;;  %v1514_v28 = vpop.f32.mrb[15].mxu1 }
 0x113   :  { %v2134_v29 = vadd.f32 %v1512_v24, %v1448_v21  ;;  %v1515_v30 = vadd.f32 %v1514_v28, %v1513_v25 }
 0x115   :  { %v2136_v31 = vadd.f32 %v1515_v30, %v1451_v27 }
 0x116   :  { %v1452_v32 = vpop.f32.mrb[16].mxu0 }
 0x117   :  { %v1516_v33 = vpop.f32.mrb[16].mxu1  ;;  %v1453_v34 = vpop.f32.mrb[17].mxu0 }
 0x118   :  { %v1454_v35 = vadd.f32 %v1453_v34, %v1452_v32  ;;  %v1517_v36 = vpop.f32.mrb[17].mxu1  ;;  %v1455_v37 = vpop.f32.mrb[18].mxu0 }
 0x119   :  { %v1518_v38 = vadd.f32 %v1517_v36, %v1516_v33  ;;  %v1519_v39 = vpop.f32.mrb[18].mxu1  ;;  %v1456_v40 = vpop.f32.mrb[19].mxu0  ;;  %v2157_v36 = vld [vmem:[%s2245_s2] ss:$0 sm:$0xff] }
 0x11a   :  { %v1457_v41 = vadd.f32 %v1456_v40, %v1455_v37  ;;  %v1520_v42 = vpop.f32.mrb[19].mxu1 }
 0x11b   :  { %v2138_v43 = vadd.f32 %v1518_v38, %v1454_v35  ;;  %v1521_v44 = vadd.f32 %v1520_v42, %v1519_v39 }
 0x11d   :  { %v2140_v45 = vadd.f32 %v1521_v44, %v1457_v41 }
 0x11e   :  { %v1458_v46 = vpop.f32.mrb[20].mxu0 }
 0x11f   :  { %v1522_v47 = vpop.f32.mrb[20].mxu1  ;;  %v1459_v48 = vpop.f32.mrb[21].mxu0 }
 0x120   :  { %v1460_v49 = vadd.f32 %v1459_v48, %v1458_v46  ;;  %v1523_v50 = vpop.f32.mrb[21].mxu1  ;;  %v1461_v52 = vpop.f32.mrb[22].mxu0 }
 0x121   :  { %v1524_v54 = vadd.f32 %v1523_v50, %v1522_v47  ;;  %v1525_v55 = vpop.f32.mrb[22].mxu1  ;;  %v1462_v56 = vpop.f32.mrb[23].mxu0 }
 0x122   :  { %v1463_v57 = vadd.f32 %v1462_v56, %v1461_v52  ;;  %v1526_v58 = vpop.f32.mrb[23].mxu1 }
 0x123   :  { %v2142_v59 = vadd.f32 %v1524_v54, %v1460_v49  ;;  %v1527_v60 = vadd.f32 %v1526_v58, %v1525_v55 }
 0x125   :  { %v2144_v61 = vadd.f32 %v1527_v60, %v1463_v57 }
 0x126   :  { %v1464_v62 = vpop.f32.mrb[24].mxu0 }
 0x127   :  { %v1528_v63 = vpop.f32.mrb[24].mxu1  ;;  %v1465_v0 = vpop.f32.mrb[25].mxu0 }
 0x128   :  { %v1466_v2 = vadd.f32 %v1465_v0, %v1464_v62  ;;  %v1529_v4 = vpop.f32.mrb[25].mxu1  ;;  %v1467_v5 = vpop.f32.mrb[26].mxu0 }
 0x129   :  { %v1530_v6 = vadd.f32 %v1529_v4, %v1528_v63  ;;  %v1531_v7 = vpop.f32.mrb[26].mxu1  ;;  %v1468_v8 = vpop.f32.mrb[27].mxu0 }
 0x12a   :  { %v1469_v9 = vadd.f32 %v1468_v8, %v1467_v5  ;;  %v1532_v10 = vpop.f32.mrb[27].mxu1 }
 0x12b   :  { %v2146_v11 = vadd.f32 %v1530_v6, %v1466_v2  ;;  %v1533_v12 = vadd.f32 %v1532_v10, %v1531_v7 }
 0x12d   :  { %v2148_v13 = vadd.f32 %v1533_v12, %v1469_v9 }
 0x12e   :  { %v1470_v14 = vpop.f32.mrb[28].mxu0 }
 0x12f   :  { %v1534_v16 = vpop.f32.mrb[28].mxu1  ;;  %v1471_v18 = vpop.f32.mrb[29].mxu0 }
 0x130   :  { %v1472_v19 = vadd.f32 %v1471_v18, %v1470_v14  ;;  %v1535_v20 = vpop.f32.mrb[29].mxu1  ;;  %v1473_v21 = vpop.f32.mrb[30].mxu0 }
 0x131   :  { %v1536_v22 = vadd.f32 %v1535_v20, %v1534_v16  ;;  %v1537_v23 = vpop.f32.mrb[30].mxu1  ;;  %v1474_v24 = vpop.f32.mrb[31].mxu0 }
 0x132   :  { %v1475_v25 = vadd.f32 %v1474_v24, %v1473_v21  ;;  %v1538_v26 = vpop.f32.mrb[31].mxu1 }
 0x133   :  { %v2150_v27 = vadd.f32 %v1536_v22, %v1472_v19  ;;  %v1539_v28 = vadd.f32 %v1538_v26, %v1537_v23 }
 0x135   :  { %v2152_v30 = vadd.f32 %v1539_v28, %v1475_v25 }
 0x136   :  { %v1556_v32 = vpop.f32.mrb[32].mxu0 }
 0x137   :  { %v1557_v33 = vpop.f32.mrb[33].mxu0 }
 0x138   :  { %v1558_v34 = vadd.f32 %v1557_v33, %v1556_v32  ;;  %v1559_v35 = vpop.f32.mrb[34].mxu0 }
 0x139   :  { %v1560_v37 = vpop.f32.mrb[35].mxu0 }
 0x13a   :  { %v958_v38 = vadd.f32 %v1558_v34, %v2122_v51  ;;  %v1561_v39 = vadd.f32 %v1560_v37, %v1559_v35 }
 0x13c   :  { %v1078_v40 = vadd.f32 %v2157_v36, %v958_v38  ;;  %v961_v41 = vadd.f32 %v1561_v39, %v2124_v53 }
 0x13e   :  { %v1079_v42 = vadd.f32 %v2157_v36, %v961_v41  ;;  %v1562_v44 = vpop.f32.mrb[36].mxu0  ;;  %v1094_v47 = vmax.f32 %v1078_v40, 0.0 }
 0x13f   :  { %v1563_v46 = vpop.f32.mrb[37].mxu0 }
 0x140   :  { %v1095_v48 = vmax.f32 %v1079_v42, 0.0  ;;  %v1564_v49 = vadd.f32 %v1563_v46, %v1562_v44  ;;  %v1565_v50 = vpop.f32.mrb[38].mxu0 }
 0x141   :  { %v1566_v52 = vpop.f32.mrb[39].mxu0 }
 0x142   :  { %v966_v54 = vadd.f32 %v1564_v49, %v2126_v1  ;;  %v1567_v55 = vadd.f32 %v1566_v52, %v1565_v50  ;;  %v1110_v56 = vpack.c.bf16 %v1095_v48, %v1094_v47 }
 0x144   :  { %v1080_v51 = vadd.f32 %v2157_v36, %v966_v54  ;;  %v969_v57 = vadd.f32 %v1567_v55, %v2128_v3  ;;  %1636 = vmatprep.mubr.bf16.mxu1 %v1110_v56 }
 0x146   :  { %v1081_v53 = vadd.f32 %v2157_v36, %v969_v57  ;;  %v1568_v58 = vpop.f32.mrb[40].mxu0  ;;  %v1096_v62 = vmax.f32 %v1080_v51, 0.0 }
 0x147   :  { %v1569_v60 = vpop.f32.mrb[41].mxu0 }
 0x148   :  { %v1097_v63 = vmax.f32 %v1081_v53, 0.0  ;;  %v1570_v0 = vadd.f32 %v1569_v60, %v1568_v58  ;;  %v1571_v2 = vpop.f32.mrb[42].mxu0 }
 0x149   :  { %v1572_v4 = vpop.f32.mrb[43].mxu0 }
 0x14a   :  { %v1111_v5 = vpack.c.bf16 %v1097_v63, %v1096_v62  ;;  %v974_v6 = vadd.f32 %v1570_v0, %v2130_v15  ;;  %v1573_v1 = vadd.f32 %v1572_v4, %v1571_v2 }
 0x14c   :  { %v1082_v7 = vadd.f32 %v2157_v36, %v974_v6  ;;  %v977_v8 = vadd.f32 %v1573_v1, %v2132_v17  ;;  %1637 = vmatmul.mubr.bf16.vlgmr.msra.gmra.mrb[32].mxu1 %v1111_v5 }
 0x14e   :  { %v1083_v3 = vadd.f32 %v2157_v36, %v977_v8  ;;  %v1574_v9 = vpop.f32.mrb[44].mxu0  ;;  %v1098_v12 = vmax.f32 %v1082_v7, 0.0 }
 0x14f   :  { %v1575_v10 = vpop.f32.mrb[45].mxu0 }
 0x150   :  { %v1099_v14 = vmax.f32 %v1083_v3, 0.0  ;;  %v1576_v16 = vadd.f32 %v1575_v10, %v1574_v9  ;;  %v1577_v18 = vpop.f32.mrb[46].mxu0 }
 0x151   :  { %v1578_v19 = vpop.f32.mrb[47].mxu0 }
 0x152   :  { %v982_v20 = vadd.f32 %v1576_v16, %v2134_v29  ;;  %v1579_v21 = vadd.f32 %v1578_v19, %v1577_v18  ;;  %v1112_v22 = vpack.c.bf16 %v1099_v14, %v1098_v12 }
 0x154   :  { %v1084_v15 = vadd.f32 %v2157_v36, %v982_v20  ;;  %v985_v23 = vadd.f32 %v1579_v21, %v2136_v31  ;;  %1640 = vmatprep.mubr.bf16.mxu1 %v1112_v22  ;;  %v1403_v20 = vld [vmem:[%s2246_s4] ss:$0 sm:$0xff] }
 0x156   :  { %v1085_v17 = vadd.f32 %v2157_v36, %v985_v23  ;;  %v1580_v24 = vpop.f32.mrb[48].mxu0  ;;  %v1100_v26 = vmax.f32 %v1084_v15, 0.0 }
 0x157   :  { %v1581_v25 = vpop.f32.mrb[49].mxu0 }
 0x158   :  { %v1101_v28 = vmax.f32 %v1085_v17, 0.0  ;;  %v1582_v32 = vadd.f32 %v1581_v25, %v1580_v24  ;;  %v1583_v33 = vpop.f32.mrb[50].mxu0 }
 0x159   :  { %v1584_v34 = vpop.f32.mrb[51].mxu0 }
 0x15a   :  { %v990_v35 = vadd.f32 %v1582_v32, %v2138_v43  ;;  %v1585_v37 = vadd.f32 %v1584_v34, %v1583_v33  ;;  %v1113_v29 = vpack.c.bf16 %v1101_v28, %v1100_v26 }
 0x15c   :  { %v1086_v38 = vadd.f32 %v2157_v36, %v990_v35  ;;  %v993_v39 = vadd.f32 %v1585_v37, %v2140_v45  ;;  %1641 = vmatmul.mubr.bf16.gmra.mrb[36].mxu1 %v1113_v29 }
 0x15e   :  { %v1087_v31 = vadd.f32 %v2157_v36, %v993_v39  ;;  %v1586_v40 = vpop.f32.mrb[52].mxu0  ;;  %v1102_v42 = vmax.f32 %v1086_v38, 0.0 }
 0x15f   :  { %v1587_v41 = vpop.f32.mrb[53].mxu0 }
 0x160   :  { %v1103_v44 = vmax.f32 %v1087_v31, 0.0  ;;  %v1588_v46 = vadd.f32 %v1587_v41, %v1586_v40  ;;  %v1589_v47 = vpop.f32.mrb[54].mxu0 }
 0x161   :  { %v1590_v48 = vpop.f32.mrb[55].mxu0 }
 0x162   :  { %v998_v49 = vadd.f32 %v1588_v46, %v2142_v59  ;;  %v1591_v50 = vadd.f32 %v1590_v48, %v1589_v47  ;;  %v1114_v43 = vpack.c.bf16 %v1103_v44, %v1102_v42 }
 0x164   :  { %v1088_v52 = vadd.f32 %v2157_v36, %v998_v49  ;;  %v1001_v54 = vadd.f32 %v1591_v50, %v2144_v61  ;;  %1644 = vmatprep.mubr.bf16.mxu1 %v1114_v43 }
 0x166   :  { %v1089_v45 = vadd.f32 %v2157_v36, %v1001_v54  ;;  %v1592_v55 = vpop.f32.mrb[56].mxu0  ;;  %v1104_v51 = vmax.f32 %v1088_v52, 0.0 }
 0x167   :  { %v1593_v56 = vpop.f32.mrb[57].mxu0 }
 0x168   :  { %v1105_v57 = vmax.f32 %v1089_v45, 0.0  ;;  %v1594_v53 = vadd.f32 %v1593_v56, %v1592_v55  ;;  %v1595_v58 = vpop.f32.mrb[58].mxu0 }
 0x169   :  { %v1596_v60 = vpop.f32.mrb[59].mxu0 }
 0x16a   :  { %v1006_v62 = vadd.f32 %v1594_v53, %v2146_v11  ;;  %v1597_v63 = vadd.f32 %v1596_v60, %v1595_v58  ;;  %v1115_v59 = vpack.c.bf16 %v1105_v57, %v1104_v51 }
 0x16c   :  { %v1090_v0 = vadd.f32 %v2157_v36, %v1006_v62  ;;  %v1009_v2 = vadd.f32 %v1597_v63, %v2148_v13  ;;  %1645 = vmatmul.mubr.bf16.gmra.mrb[40].mxu1 %v1115_v59 }
 0x16e   :  { %v1091_v61 = vadd.f32 %v2157_v36, %v1009_v2  ;;  %v1598_v4 = vpop.f32.mrb[60].mxu0  ;;  %v1106_v6 = vmax.f32 %v1090_v0, 0.0 }
 0x16f   :  { %v1599_v5 = vpop.f32.mrb[61].mxu0 }
 0x170   :  { %v1107_v1 = vmax.f32 %v1091_v61, 0.0  ;;  %v1600_v7 = vadd.f32 %v1599_v5, %v1598_v4  ;;  %v1601_v8 = vpop.f32.mrb[62].mxu0 }
 0x171   :  { %v1602_v3 = vpop.f32.mrb[63].mxu0 }
 0x172   :  { %v1014_v9 = vadd.f32 %v1600_v7, %v2150_v27  ;;  %v1603_v10 = vadd.f32 %v1602_v3, %v1601_v8  ;;  %v1116_v11 = vpack.c.bf16 %v1107_v1, %v1106_v6 }
 0x174   :  { %v1092_v12 = vadd.f32 %v2157_v36, %v1014_v9  ;;  %v1017_v14 = vadd.f32 %v1603_v10, %v2152_v30  ;;  %1648 = vmatprep.mubr.bf16.mxu1 %v1116_v11 }
 0x176   :  { %v1093_v13 = vadd.f32 %v2157_v36, %v1017_v14  ;;  %v1108_v16 = vmax.f32 %v1092_v12, 0.0 }
 0x178   :  { %v1109_v18 = vmax.f32 %v1093_v13, 0.0 }
 0x17a   :  { %v1117_v19 = vpack.c.bf16 %v1109_v18, %v1108_v16 }
 0x17c   :  { %1649 = vmatmul.mubr.bf16.gmra.mrb[44].mxu1 %v1117_v19 }
 0x21f   :  { %v1638_v21 = vpop.f32.mrb[32].mxu1 }
 0x220   :  { %v1232_v22 = vadd.f32 %v1638_v21, %v1403_v20  ;;  %v1223_v27 = vpop.f32.mrb[33].mxu1 }
 0x221   :  { %v1224_v15 = vadd.f32 %v1403_v20, %v1223_v27  ;;  %v1639_v23 = vpop.f32.mrb[34].mxu1 }
 0x222   :  { %1288 = vst [vmem:[%s2247_s5 + $0x10] sm:$0xff] %v1232_v22  ;;  %v1235_v30 = vadd.f32 %v1639_v23, %v1403_v20  ;;  %v1226_v17 = vpop.f32.mrb[35].mxu1 }
 0x223   :  { %1286 = vst [vmem:[%s2247_s5] sm:$0xff] %v1224_v15  ;;  %v1227_v36 = vadd.f32 %v1403_v20, %v1226_v17 }
 0x224   :  { %1289 = vst [vmem:[%s2247_s5 + $0x18] sm:$0xff] %v1235_v30 }
 0x225   :  { %1287 = vst [vmem:[%s2247_s5 + $0x8] sm:$0xff] %v1227_v36 }
 0x22f   :  { %v1642_v24 = vpop.f32.mrb[36].mxu1 }
 0x230   :  { %v1248_v25 = vadd.f32 %v1642_v24, %v1403_v20  ;;  %v1239_v26 = vpop.f32.mrb[37].mxu1 }
 0x231   :  { %v1240_v28 = vadd.f32 %v1403_v20, %v1239_v26  ;;  %v1643_v32 = vpop.f32.mrb[38].mxu1 }
 0x232   :  { %1292 = vst [vmem:[%s2247_s5 + $0x30] sm:$0xff] %v1248_v25  ;;  %v1251_v33 = vadd.f32 %v1643_v32, %v1403_v20  ;;  %v1242_v34 = vpop.f32.mrb[39].mxu1 }
 0x233   :  { %1290 = vst [vmem:[%s2247_s5 + $0x20] sm:$0xff] %v1240_v28  ;;  %v1243_v35 = vadd.f32 %v1403_v20, %v1242_v34 }
 0x234   :  { %1293 = vst [vmem:[%s2247_s5 + $0x38] sm:$0xff] %v1251_v33 }
 0x235   :  { %1291 = vst [vmem:[%s2247_s5 + $0x28] sm:$0xff] %v1243_v35 }
 0x23f   :  { %v1646_v37 = vpop.f32.mrb[40].mxu1 }
 0x240   :  { %v1264_v29 = vadd.f32 %v1646_v37, %v1403_v20  ;;  %v1255_v38 = vpop.f32.mrb[41].mxu1 }
 0x241   :  { %v1256_v39 = vadd.f32 %v1403_v20, %v1255_v38  ;;  %v1647_v31 = vpop.f32.mrb[42].mxu1 }
 0x242   :  { %1296 = vst [vmem:[%s2247_s5 + $0x50] sm:$0xff] %v1264_v29  ;;  %v1267_v40 = vadd.f32 %v1647_v31, %v1403_v20  ;;  %v1258_v41 = vpop.f32.mrb[43].mxu1 }
 0x243   :  { %1294 = vst [vmem:[%s2247_s5 + $0x40] sm:$0xff] %v1256_v39  ;;  %v1259_v42 = vadd.f32 %v1403_v20, %v1258_v41 }
 0x244   :  { %1297 = vst [vmem:[%s2247_s5 + $0x58] sm:$0xff] %v1267_v40 }
 0x245   :  { %1295 = vst [vmem:[%s2247_s5 + $0x48] sm:$0xff] %v1259_v42 }
 0x24f   :  { %v1650_v44 = vpop.f32.mrb[44].mxu1 }
 0x250   :  { %v1280_v46 = vadd.f32 %v1650_v44, %v1403_v20  ;;  %v1271_v47 = vpop.f32.mrb[45].mxu1 }
 0x251   :  { %v1272_v48 = vadd.f32 %v1403_v20, %v1271_v47  ;;  %v1651_v49 = vpop.f32.mrb[46].mxu1 }
 0x252   :  { %1300 = vst [vmem:[%s2247_s5 + $0x70] sm:$0xff] %v1280_v46  ;;  %v1283_v50 = vadd.f32 %v1651_v49, %v1403_v20  ;;  %v1274_v43 = vpop.f32.mrb[47].mxu1 }
 0x253   :  { %1298 = vst [vmem:[%s2247_s5 + $0x60] sm:$0xff] %v1272_v48  ;;  %v1275_v52 = vadd.f32 %v1403_v20, %v1274_v43 }
 0x254   :  { %1301 = vst [vmem:[%s2247_s5 + $0x78] sm:$0xff] %v1283_v50 }
 0x255   :  { %1299 = vst [vmem:[%s2247_s5 + $0x68] sm:$0xff] %v1275_v52 }

</bundles_post_ra>
